<compile_context>
chip_gen: v5e
topology: v5e:2x2
jax: 0.10.0
libtpu: 0.0.40
codegen_flags: <defaults>
</compile_context>

<pallas_src>
import jax
import jax.numpy as jnp
from jax import lax
from jax.experimental import pallas as pl
from jax.experimental.pallas import tpu as pltpu


def _round_up(x, m):
    return (x + m - 1) // m * m


# ----------------------- gather path (large vocab) --------------------------
def _embed_kernel_gather(tok_ref, w_ref, out_ref):
    """Gather one block of token rows from the VMEM-resident table chunk.

    tok_ref: (n_pad,) int32 scalar-prefetched token ids (SMEM).
    w_ref:   (d_vocab, dm_chunk) slab of W_E^T (VMEM, constant across token axis).
    out_ref: (tok_block, dm_chunk) dense output slab for this grid step.
    """
    tok_block = out_ref.shape[0]
    base = pl.program_id(1) * tok_block

    def body(t, carry):
        row = tok_ref[base + t]                               # scalar read (SMEM)
        out_ref[pl.ds(t, 1), :] = w_ref[pl.ds(row, 1), :]     # VMEM->VMEM row copy
        return carry

    # Partial unroll gives the scheduler room to overlap scalar reads with
    # the dynamic-slice loads/stores of neighbouring iterations.
    lax.fori_loop(0, tok_block, body, 0, unroll=8)


# ----------------------- one-hot MXU path (small vocab) ---------------------
def _embed_kernel_onehot(tok_ref, w_ref, out_ref):
    """Vectorized gather via one-hot x table matmul (MXU), no serial loop.

    tok_ref: (tok_block, 1) int32 token ids (VMEM block).
    w_ref:   (d_vocab, dm_chunk) slab of W_E^T (VMEM, constant across token axis).
    out_ref: (tok_block, dm_chunk) dense output slab.
    """
    ids = tok_ref[...]                                        # (tok_block, 1)
    tok_block = ids.shape[0]
    d_vocab = w_ref.shape[0]
    iota = lax.broadcasted_iota(jnp.int32, (tok_block, d_vocab), 1)
    one_hot = (ids == iota).astype(w_ref.dtype)               # exact 0/1 in any dtype
    out_ref[...] = jnp.dot(one_hot, w_ref[...],
                           preferred_element_type=jnp.float32).astype(out_ref.dtype)


def _pick_dm_chunk(d_vocab, d_model, itemsize, budget_bytes):
    """Widest lane-dense d_model chunk whose table slab fits the VMEM budget."""
    if d_vocab * d_model * itemsize <= budget_bytes:
        return d_model
    for c in (2048, 1024, 512, 256, 128):
        if d_model % c == 0 and d_vocab * c * itemsize <= budget_bytes:
            return c
    # TODO(synk): tables too large even for a 128-lane chunk need the
    # HBM-resident manual-DMA gather path (memory_space=pl.ANY + deep prefetch).
    return d_model


def embed(tokens, W_E, *, tok_block=256, use_onehot=None, onehot_vocab_cutoff=1024):
    """tokens: (batch, pos) int, W_E: (d_model, d_vocab) -> (batch, pos, d_model)."""
    batch, pos = tokens.shape
    d_model, d_vocab = W_E.shape
    itemsize = jnp.dtype(W_E.dtype).itemsize

    # One transpose so each token id indexes a contiguous, lane-dense row.
    # TODO(synk): for production-size tables store the embedding as
    # (d_vocab, d_model) so this per-call HBM transpose disappears.
    w_t = W_E.T  # (d_vocab, d_model)

    # Clamp ids so an out-of-range token cannot drive an OOB row access.
    flat = jnp.clip(tokens.reshape(-1).astype(jnp.int32), 0, d_vocab - 1)
    n = flat.shape[0]

    # Token-block sizing: many tokens per step, sublane-aligned (16 covers
    # both f32 and bf16 packing).
    tok_block = min(tok_block, _round_up(n, 16))
    n_pad = _round_up(n, tok_block)
    if n_pad != n:
        flat = jnp.pad(flat, (0, n_pad - n))  # pad ids = 0 (valid row), sliced off below
    # TODO(synk): chunk the token array across multiple pallas_calls if
    # batch*pos is large enough that the SMEM-prefetched id array
    # (next_pow2(4*n) bytes) would not fit in SMEM.

    # Keep the table (or a lane-dense d_model chunk of it) resident in VMEM.
    table_budget = 40 * 1024 * 1024  # headroom on v7x's 64 MiB VMEM
    dm_chunk = _pick_dm_chunk(d_vocab, d_model, itemsize, table_budget)
    n_dm = d_model // dm_chunk
    n_tb = n_pad // tok_block

    if use_onehot is None:
        # For small vocabularies the one-hot matmul is cheap (2*d_vocab flops
        # per output element on a 900+ TF/s MXU) and fully vectorized; for
        # large vocabularies the row-gather loop avoids O(d_vocab) work/token.
        use_onehot = d_vocab <= onehot_vocab_cutoff

    vmem_need = (2 * d_vocab * dm_chunk * itemsize           # table slab (double-buffer worst case)
                 + 2 * tok_block * dm_chunk * itemsize       # double-buffered output block
                 + (2 << 20))
    vmem_limit = int(min(max(vmem_need, 32 * 1024 * 1024), 64 * 1024 * 1024))
    cparams = pltpu.CompilerParams(
        dimension_semantics=("parallel", "parallel"),        # v7x: shard across both TCs
        vmem_limit_bytes=vmem_limit,
    )

    if use_onehot:
        out_flat = pl.pallas_call(
            _embed_kernel_onehot,
            out_shape=jax.ShapeDtypeStruct((n_pad, d_model), W_E.dtype),
            grid=(n_dm, n_tb),                               # (d_model chunks, token blocks)
            in_specs=[
                # Token ids for this block (VMEM, lane-dim 1 = full extent).
                pl.BlockSpec((tok_block, 1), lambda j, i: (i, 0)),
                # Table chunk: constant across the (inner) token-block axis, so it
                # stays VMEM-resident instead of being re-fetched every step.
                pl.BlockSpec((d_vocab, dm_chunk), lambda j, i: (0, j)),
            ],
            out_specs=pl.BlockSpec((tok_block, dm_chunk), lambda j, i: (i, j)),
            compiler_params=cparams,
        )(flat.reshape(n_pad, 1), w_t)
    else:
        out_flat = pl.pallas_call(
            _embed_kernel_gather,
            out_shape=jax.ShapeDtypeStruct((n_pad, d_model), W_E.dtype),
            grid_spec=pltpu.PrefetchScalarGridSpec(
                num_scalar_prefetch=1,                       # flat token ids -> SMEM
                grid=(n_dm, n_tb),                           # (d_model chunks, token blocks)
                in_specs=[
                    pl.BlockSpec((d_vocab, dm_chunk), lambda j, i, tok: (0, j)),
                ],
                out_specs=pl.BlockSpec((tok_block, dm_chunk), lambda j, i, tok: (i, j)),
            ),
            compiler_params=cparams,
        )(flat, w_t)

    return out_flat[:n].reshape(batch, pos, d_model)


if __name__ == "__main__":
    # Small synthetic config: d_model=32, d_vocab=64, batch=2, pos=8.
    d_model, d_vocab = 32, 64
    batch, pos = 2, 8

    key = jax.random.PRNGKey(0)
    k_w, k_tok = jax.random.split(key)
    W_E = jax.random.normal(k_w, (d_model, d_vocab), dtype=jnp.float32)
    tokens = jax.random.randint(k_tok, (batch, pos), 0, d_vocab, dtype=jnp.int32)

    # Reference (plain JAX): out[b, p, :] == W_E[:, tokens[b, p]]
    ref = jnp.transpose(W_E[:, tokens], (1, 2, 0))

    # Exercise both gather strategies at the small shape.
    out_onehot = jax.block_until_ready(embed(tokens, W_E, use_onehot=True))
    out_gather = jax.block_until_ready(embed(tokens, W_E, use_onehot=False))

    assert out_onehot.shape == (batch, pos, d_model), out_onehot.shape
    assert out_gather.shape == (batch, pos, d_model), out_gather.shape
    assert jnp.allclose(out_onehot, ref), "one-hot path mismatch vs reference"
    assert jnp.allclose(out_gather, ref), "gather path mismatch vs reference"

    print("KERNEL_OK")
</pallas_src>

<mosaic_0001>
module attributes {stable_mosaic.version = 11 : i64} {
  func.func @_embed_kernel_onehot(%arg0: i32, %arg1: i32, %arg2: memref<16x1xi32, #tpu.memory_space<vmem>>, %arg3: memref<64x32xf32, #tpu.memory_space<vmem>>, %arg4: memref<16x32xf32, #tpu.memory_space<vmem>>) attributes {dimension_semantics = [#tpu.dimension_semantics<parallel>, #tpu.dimension_semantics<parallel>], iteration_bounds = array<i64: 1, 1>, scalar_prefetch = 0 : i64, scratch_operands = 0 : i64, tpu.core_type = #tpu.core_type<tc>, window_params = [{transform_indices = @transform_0, window_bounds = array<i64: 16, 1>}, {transform_indices = @transform_1, window_bounds = array<i64: 64, 32>}, {transform_indices = @transform_2, window_bounds = array<i64: 16, 32>}]} {
    %c0 = arith.constant 0 : index
    %c0_0 = arith.constant 0 : index
    %0 = vector.load %arg2[%c0, %c0_0] : memref<16x1xi32, #tpu.memory_space<vmem>>, vector<16x1xi32>
    %1 = tpu.iota {dimensions = array<i32: 1>} : vector<16x64xi32>
    %2 = vector.broadcast %0 : vector<16x1xi32> to vector<16x64xi32>
    %3 = arith.cmpi eq, %2, %1 : vector<16x64xi32>
    %4 = arith.extui %3 : vector<16x64xi1> to vector<16x64xi32>
    %5 = arith.sitofp %4 : vector<16x64xi32> to vector<16x64xf32>
    %c0_1 = arith.constant 0 : index
    %c0_2 = arith.constant 0 : index
    %6 = vector.load %arg3[%c0_1, %c0_2] : memref<64x32xf32, #tpu.memory_space<vmem>>, vector<64x32xf32>
    %cst = arith.constant dense<0.000000e+00> : vector<16x32xf32>
    %7 = tpu.matmul %5, %6, %cst {dimension_numbers = #tpu.dot_dimension_numbers<[1], [0], [0], [1], [0, 0, 1, 1], [], []>} : vector<16x64xf32>, vector<64x32xf32>, vector<16x32xf32> -> vector<16x32xf32>
    %c0_3 = arith.constant 0 : index
    %c0_4 = arith.constant 0 : index
    %8 = vector.load %arg4[%c0_3, %c0_4] : memref<16x32xf32, #tpu.memory_space<vmem>>, vector<16x32xf32>
    tpu.vector_store %arg4[%c0_3, %c0_4], %7 {strides = array<i32>} : memref<16x32xf32, #tpu.memory_space<vmem>>, vector<16x32xf32>,
    return
  }
  func.func @transform_0(%arg0: i32, %arg1: i32) -> (i32, i32) {
    %c0_i32 = arith.constant 0 : i32
    %c0_i32_0 = arith.constant 0 : i32
    return %arg1, %c0_i32 : i32, i32
  }
  func.func @transform_1(%arg0: i32, %arg1: i32) -> (i32, i32) {
    %c0_i32 = arith.constant 0 : i32
    %c0_i32_0 = arith.constant 0 : i32
    return %c0_i32, %arg0 : i32, i32
  }
  func.func @transform_2(%arg0: i32, %arg1: i32) -> (i32, i32) {
    %c0_i32 = arith.constant 0 : i32
    return %arg1, %arg0 : i32, i32
  }
}

</mosaic_0001>

<bundles_post_ra>
// kernel: tpu_custom_call.1
= control target key start
LH: loop header
LB: loop body
LE: loop exit
PB: predicated region body
PF: predicated region fallthrough
CT: control target
= control target key end

     0   :  { %v131_v2 = vmov 0   ;;  %s184_s0 = inlined_call_operand.vmem [shape: s32[16,1], index: 0, kind: input, shape index: {}]   ;;  %s185_s1 = inlined_call_operand.vmem [shape: f32[64,32], index: 1, kind: input, shape index: {}]   ;;  %s186_s2 = inlined_call_operand.hbm [shape: f32[16,32], index: 2, kind: output, shape index: {}]  }
   0x1   :  { %v12_v0 = vld [vmem:[%s184_s0] sm:$0xff]  ;;  %v35_v1 = vld [vmem:[%s185_s1 + $0x38] sm:$0xff]  ;;  %104 = vset.pattern.permute.xlu0 %v131_v2  ;;  %v34_v3 = vld [vmem:[%s185_s1 + $0x30] sm:$0xff] }
   0x2   :  { %51 = vmatpush.msra.mxu0 %v35_v1  ;;  %17 = vperm.xlu0 %104, %v12_v0   ;;  %v33_v4 = vld [vmem:[%s185_s1 + $0x28] sm:$0xff] }
   0x3   :  { %91 = vmatpush.msra.mxu1 %v35_v1 }
   0x4   :  { %52 = vmatpush.msra.mxu0 %v34_v3 }
   0x5   :  { %7 = vsyncpa [#allocation3], 0  ;;  %v32_v5 = vld [vmem:[%s185_s1 + $0x20] sm:$0xff]  ;;  %92 = vmatpush.msra.mxu1 %v34_v3  ;;  %v31_v6 = vld [vmem:[%s185_s1 + $0x18] sm:$0xff]  ;;  %v14_v11 = vlaneseq  ;;  %vm36_vm0 = vcmask 523264   ;;  %v132_v14 = vmov 0.0  }
   0x6   :  { %53 = vmatpush.msra.mxu0 %v33_v4  ;;  %v13_v7 = vld [vmem:[%s184_s0 + $0x8] sm:$0xff]  ;;  %v30_v8 = vld [vmem:[%s185_s1 + $0x10] sm:$0xff]  ;;  %v28_v10 = vld [vmem:[%s185_s1] sm:$0xff]  ;;  %vm66_vm3 = vcmask 261120   ;;  %s133_s0 = smov [#allocation2]   ;;  %s75_s3 = sshll.u32 %s186_s2, 4  ;;  %s76_s3 = int_to_ptr.hbm [resolvable:$true] %s75_s3 }
   0x7   :  { %93 = vmatpush.msra.mxu1 %v33_v4  ;;  %v29_v9 = vld [vmem:[%s185_s1 + $0x8] sm:$0xff]  ;;  %v15_v12 = vand.u32 127, %v14_v11  ;;  %s73_s29 = sshll.u32 %s133_s0, 4  ;;  %s134_s4 = smov 128   ;;  %s74_s29 = int_to_ptr.vmem [resolvable:$true] %s73_s29 }
   0x8   :  { %54 = vmatpush.msra.mxu0 %v32_v5  ;;  %s135_s5 = smov 8  }
   0x9   :  { %94 = vmatpush.msra.mxu1 %v32_v5 }
   0xa   :  { %55 = vmatpush.msra.mxu0 %v31_v6  ;;  %20 = vperm.xlu0 %104, %v13_v7  }
   0xb   :  { %95 = vmatpush.msra.mxu1 %v31_v6 }
   0xc   :  { %56 = vmatpush.msra.mxu0 %v30_v8 }
   0xd   :  { %96 = vmatpush.msra.mxu1 %v30_v8 }
   0xe   :  { %57 = vmatpush.msra.mxu0 %v29_v9 }
   0xf   :  { %97 = vmatpush.msra.mxu1 %v29_v9 }
  0x10   :  { %58 = vmatpush.msra.mxu0 %v28_v10 }
  0x11   :  { %98 = vmatpush.msra.mxu1 %v28_v10 }
  0x74   :  { %v18_v13 = vpop.permute.xlu0 %17 }
  0x75   :  { %vm22_vm1 = vcmp.eq.s32.totalorder %v18_v13, %v15_v12 }
  0x76   :  { %v87_v15 = vsel %vm22_vm1, 1.0, %v132_v14 }
  0x77   :  { %89 = vmatmul.msk.f32.vlgmr.msra.gmra.mxu0 %vm36_vm0, %v87_v15 }
  0x7c   :  { %v21_v16 = vpop.permute.xlu0 %20 }
  0x7d   :  { %vm23_vm2 = vcmp.eq.s32.totalorder %v21_v16, %v15_v12 }
  0x7e   :  { %v88_v17 = vsel %vm23_vm2, 1.0, %v132_v14 }
  0x7f   :  { %90 = vmatmul.msk.f32.vlgmr.msra.gmra.mxu1 %vm36_vm0, %v88_v17 }
  0xf4   :  { %v60_v18 = vpop.f32.mrf.mxu0 }
  0xf5   :  { %67 = vst.msk [vmem:[#allocation2] sm:$0xff] %vm66_vm3, %v60_v18 }
  0xfc   :  { %v63_v19 = vpop.f32.mrf.mxu1 }
  0xfd   :  { %68 = vst.msk [vmem:[#allocation2 + $0x8] sm:$0xff] %vm66_vm3, %v63_v19 }
  0xfe   :  { %81 = dma.vmem_to_hbm [thread:$0]  %s74_s29, 256, %s76_s3, [#allocation3], %s134_s4, %s134_s4, %s135_s5  }
  0xff   :  { %129 = dma.done.wait [#allocation3], 256  }
 0x100   :  { %130 = vsyncadd [#allocation3], 4294967040 }
 0x101   :  { %86 = vsyncpa [#allocation3], 1 }

</bundles_post_ra>
